<compile_context>
chip_gen: v7x
topology: tpu7x:2x2x1
jax: 0.10.0
libtpu: 0.0.40
codegen_flags: <defaults>
</compile_context>

<pallas_src>
import functools

import jax
import jax.numpy as jnp
from jax.experimental import pallas as pl
from jax.experimental.pallas import tpu as pltpu


# ---------------------------------------------------------------------------
# Pallas kernels (fused im2col: kh*kw shifted-slice matmuls, f32 accumulation)
# ---------------------------------------------------------------------------
def _kf_train_kernel(xt_ref, xb_ref, w_ref, b_ref, s_ref, o_ref, *,
                     kh, kw, wp, l_out):
    """Fused conv + bias + knockoff mix for one (top, bottom) batch pair.

    xt_ref: (1, Cin, Lf)        flattened padded image, first batch half
    xb_ref: (1, Cin, Lf)        flattened padded image, second batch half
    w_ref : (kh*kw, Cout, Cin)  conv weight, shift-major
    b_ref : (Cout, 1)           bias
    s_ref : (Cout, 1)           kf_scale
    o_ref : (2, 1, Cout, L)     [0]=s*conv(top)+(1-s)*conv(bot)+b, [1]=conv(bot)+b
    """
    acc_t = None
    acc_b = None
    for i in range(kh):
        for j in range(kw):
            off = i * wp + j
            w_ij = w_ref[i * kw + j]                       # (Cout, Cin)
            xt = xt_ref[0, :, pl.ds(off, l_out)]           # (Cin, L)
            xb = xb_ref[0, :, pl.ds(off, l_out)]           # (Cin, L)
            t = jnp.dot(w_ij, xt, preferred_element_type=jnp.float32)
            b = jnp.dot(w_ij, xb, preferred_element_type=jnp.float32)
            acc_t = t if acc_t is None else acc_t + t
            acc_b = b if acc_b is None else acc_b + b
    bias = b_ref[...]                                      # (Cout, 1)
    scale = s_ref[...]                                     # (Cout, 1)
    bot = acc_b + bias                                     # bias added once
    o_ref[0, 0] = (bot + scale * (acc_t - acc_b)).astype(o_ref.dtype)
    o_ref[1, 0] = bot.astype(o_ref.dtype)


def _kf_eval_kernel(x_ref, w_ref, b_ref, o_ref, *, kh, kw, wp, l_out):
    """Fused conv + bias for one image (eval path)."""
    acc = None
    for i in range(kh):
        for j in range(kw):
            off = i * wp + j
            w_ij = w_ref[i * kw + j]                       # (Cout, Cin)
            xs = x_ref[0, :, pl.ds(off, l_out)]            # (Cin, L)
            t = jnp.dot(w_ij, xs, preferred_element_type=jnp.float32)
            acc = t if acc is None else acc + t
    o_ref[0] = (acc + b_ref[...]).astype(o_ref.dtype)


# ---------------------------------------------------------------------------
# Helpers
# ---------------------------------------------------------------------------
def _vmem_limit(per_step_bytes):
    """Generation-aware scoped-VMEM limit: 3/4 of physical VMEM as the cap
    (96 MiB on 128 MiB parts, 48 MiB on v7x's 64 MiB)."""
    try:
        phys = pltpu.get_tpu_info().vmem_capacity_bytes
    except Exception:  # conservative default if the query is unavailable
        phys = 64 * 1024 * 1024
    cap = int(phys * 3 // 4)
    return int(min(max(2 * per_step_bytes, 32 * 1024 * 1024), cap))


# ---------------------------------------------------------------------------
# Wrapper: KfConv2d forward
# ---------------------------------------------------------------------------
@functools.partial(jax.jit,
                   static_argnames=("stride", "pad", "training", "compute_dtype"))
def kf_conv2d_forward(x, weight, bias, kf_scale, *, stride=1, pad=1,
                      training=True, compute_dtype=jnp.bfloat16):
    """KfConv2d.forward.

    x       : (N, Cin, H, W)        NCHW
    weight  : (Cout, Cin, kh, kw)   OIHW (PyTorch layout)
    bias    : (Cout,)
    kf_scale: (1, Cout, 1, 1)
    returns : (N, Cout, Hout, Wout) NCHW
    """
    if stride != 1:
        # TODO(synk): strided conv (pl.ds(..., stride=s) lane loads) not fused.
        raise NotImplementedError("fused KfConv2d kernel supports stride=1 only")

    n, cin, h, w = x.shape
    cout, _, kh, kw = weight.shape
    out_dtype = x.dtype
    csize = jnp.dtype(compute_dtype).itemsize
    osize = jnp.dtype(out_dtype).itemsize

    hp, wp = h + 2 * pad, w + 2 * pad
    hout, wout = hp - kh + 1, wp - kw + 1
    l_out = hout * wp            # padded-width output row length (junk cols >= wout)
    lf = (hp + 1) * wp           # one extra padded row so every shifted slice fits

    # One O(input) cast + pad; reshape to flat spatial is free.
    xq = x.astype(compute_dtype)
    xp = jnp.pad(xq, ((0, 0), (0, 0), (pad, pad + 1), (pad, pad)))
    xf = xp.reshape(n, cin, lf)

    w_r = (weight.transpose(2, 3, 0, 1)
           .reshape(kh * kw, cout, cin).astype(compute_dtype))   # (kh*kw, Cout, Cin)
    b_r = bias.reshape(cout, 1).astype(jnp.float32)
    s_r = kf_scale.reshape(cout, 1).astype(jnp.float32)

    w_bytes = kh * kw * cout * cin * csize + 2 * cout * 4

    if not training:
        per_step = (2 * cin * lf * csize            # x block, double-buffered
                    + 2 * cout * l_out * osize      # out block, double-buffered
                    + 2 * w_bytes                   # weight/bias, double-buffered
                    + 3 * cout * l_out * 4          # accumulator / epilogue temps
                    + 2 * cin * l_out * csize)      # shifted-slice staging
        flops = 2 * n * cout * cin * kh * kw * l_out
        bytes_acc = (n * cin * lf * csize + w_bytes + n * cout * l_out * osize)

        kern = functools.partial(_kf_eval_kernel, kh=kh, kw=kw, wp=wp, l_out=l_out)
        out = pl.pallas_call(
            kern,
            out_shape=jax.ShapeDtypeStruct((n, cout, l_out), out_dtype),
            grid=(n,),
            in_specs=[
                pl.BlockSpec((1, cin, lf), lambda i: (i, 0, 0)),          # image i
                pl.BlockSpec((kh * kw, cout, cin), lambda i: (0, 0, 0)),  # weight
                pl.BlockSpec((cout, 1), lambda i: (0, 0)),                # bias
            ],
            out_specs=pl.BlockSpec((1, cout, l_out), lambda i: (i, 0, 0)),
            compiler_params=pltpu.CompilerParams(
                dimension_semantics=("parallel",),
                vmem_limit_bytes=_vmem_limit(per_step)),
            cost_estimate=pl.CostEstimate(
                flops=flops, transcendentals=0, bytes_accessed=bytes_acc),
        )(xf, w_r, b_r)

        out = out.reshape(n, cout, hout, wp)[:, :, :, :wout]   # drop pad columns
        return out

    # ---------------- training path: knockoff mix of the two batch halves ----
    if n % 2 != 0:
        # PyTorch original also requires an even batch (broadcast in the mix).
        raise ValueError("KfConv2d training forward requires an even batch.")
    num_ori = n // 2

    per_step = (4 * cin * lf * csize                 # two x blocks, double-buffered
                + 4 * cout * l_out * osize           # (2, Cout, L) out, double-buffered
                + 2 * w_bytes
                + 6 * cout * l_out * 4               # two accumulators + temps
                + 4 * cin * l_out * csize)           # shifted-slice staging
    flops = 2 * n * cout * cin * kh * kw * l_out
    bytes_acc = (n * cin * lf * csize + w_bytes + n * cout * l_out * osize)

    kern = functools.partial(_kf_train_kernel, kh=kh, kw=kw, wp=wp, l_out=l_out)
    out = pl.pallas_call(
        kern,
        out_shape=jax.ShapeDtypeStruct((2, num_ori, cout, l_out), out_dtype),
        grid=(num_ori,),
        in_specs=[
            # Both halves read from the SAME flattened input; the second spec
            # is offset by num_ori batch blocks (no HBM slice copies).
            pl.BlockSpec((1, cin, lf), lambda i: (i, 0, 0)),                # top half
            pl.BlockSpec((1, cin, lf), lambda i: (i + num_ori, 0, 0)),      # bottom half
            pl.BlockSpec((kh * kw, cout, cin), lambda i: (0, 0, 0)),        # weight
            pl.BlockSpec((cout, 1), lambda i: (0, 0)),                      # bias
            pl.BlockSpec((cout, 1), lambda i: (0, 0)),                      # kf_scale
        ],
        out_specs=pl.BlockSpec((2, 1, cout, l_out), lambda i: (0, i, 0, 0)),
        compiler_params=pltpu.CompilerParams(
            dimension_semantics=("parallel",),
            vmem_limit_bytes=_vmem_limit(per_step)),
        cost_estimate=pl.CostEstimate(
            flops=flops, transcendentals=0, bytes_accessed=bytes_acc),
    )(xf, xf, w_r, b_r, s_r)

    # (2, num_ori, Cout, Hout*Wp) -> NCHW with mixed half first (free reshape),
    # then drop the junk pad columns.
    out = out.reshape(n, cout, hout, wp)[:, :, :, :wout]
    return out


# ---------------------------------------------------------------------------
# Pure-JAX reference (for verification)
# ---------------------------------------------------------------------------
def _reference(x, weight, bias, kf_scale, stride=1, pad=1, training=True):
    y = jax.lax.conv_general_dilated(
        x, weight, window_strides=(stride, stride),
        padding=((pad, pad), (pad, pad)),
        dimension_numbers=("NCHW", "OIHW", "NCHW"))
    y = y + bias.reshape(1, -1, 1, 1)
    if training:
        num_ori = x.shape[0] // 2
        top = kf_scale * y[:num_ori] + (1.0 - kf_scale) * y[num_ori:]
        y = jnp.concatenate([top, y[num_ori:]], axis=0)
    return y


if __name__ == "__main__":
    key = jax.random.PRNGKey(0)
    kx, kw_, kb = jax.random.split(key, 3)

    # org_cong := Conv2d(in=4, out=8, kernel=3x3, stride=1, padding=1)
    N, Cin, H, W = 2, 4, 16, 16
    Cout, KH, KW = 8, 3, 3

    x = jax.random.normal(kx, (N, Cin, H, W), dtype=jnp.float32)
    weight = jax.random.normal(kw_, (Cout, Cin, KH, KW), dtype=jnp.float32) * 0.1
    bias = jax.random.normal(kb, (Cout,), dtype=jnp.float32) * 0.1
    kf_scale = jnp.full((1, Cout, 1, 1), 0.5, dtype=jnp.float32)  # fill_(0.5)

    ref_tr = _reference(x, weight, bias, kf_scale, 1, 1, True)
    ref_ev = _reference(x, weight, bias, kf_scale, 1, 1, False)

    # Training path, f32 compute (tight tolerance).
    out_tr = jax.block_until_ready(
        kf_conv2d_forward(x, weight, bias, kf_scale, stride=1, pad=1,
                          training=True, compute_dtype=jnp.float32))
    assert out_tr.shape == ref_tr.shape == (N, Cout, H, W)
    assert jnp.allclose(out_tr, ref_tr, rtol=1e-4, atol=1e-4), "train f32 mismatch"

    # Eval path, f32 compute (tight tolerance).
    out_ev = jax.block_until_ready(
        kf_conv2d_forward(x, weight, bias, kf_scale, stride=1, pad=1,
                          training=False, compute_dtype=jnp.float32))
    assert out_ev.shape == ref_ev.shape
    assert jnp.allclose(out_ev, ref_ev, rtol=1e-4, atol=1e-4), "eval f32 mismatch"

    # Training path with the default bf16 compute dtype (f32 accumulation).
    out_bf = jax.block_until_ready(
        kf_conv2d_forward(x, weight, bias, kf_scale, stride=1, pad=1,
                          training=True))
    assert jnp.allclose(out_bf, ref_tr, rtol=1e-1, atol=1e-1), "bf16 mismatch"

    print("KERNEL_OK")
</pallas_src>

<mosaic_0001>
module attributes {stable_mosaic.version = 11 : i64} {
  func.func @_kf_train_kernel(%arg0: i32, %arg1: memref<1x4x342xf32, #tpu.memory_space<vmem>>, %arg2: memref<1x4x342xf32, #tpu.memory_space<vmem>>, %arg3: memref<9x8x4xf32, #tpu.memory_space<vmem>>, %arg4: memref<8x1xf32, #tpu.memory_space<vmem>>, %arg5: memref<8x1xf32, #tpu.memory_space<vmem>>, %arg6: memref<2x1x8x288xf32, #tpu.memory_space<vmem>>) attributes {dimension_semantics = [#tpu.dimension_semantics<parallel>], iteration_bounds = array<i64: 1>, scalar_prefetch = 0 : i64, scratch_operands = 0 : i64, tpu.core_type = #tpu.core_type<tc>, window_params = [{transform_indices = @transform_0, window_bounds = array<i64: 1, 4, 342>}, {transform_indices = @transform_1, window_bounds = array<i64: 1, 4, 342>}, {pipeline_mode = #tpu.pipeline_mode<synchronous>, transform_indices = @transform_2, window_bounds = array<i64: 9, 8, 4>}, {pipeline_mode = #tpu.pipeline_mode<synchronous>, transform_indices = @transform_3, window_bounds = array<i64: 8, 1>}, {pipeline_mode = #tpu.pipeline_mode<synchronous>, transform_indices = @transform_4, window_bounds = array<i64: 8, 1>}, {transform_indices = @transform_5, window_bounds = array<i64: 2, 1, 8, 288>}]} {
    %c0 = arith.constant 0 : index
    %c0_0 = arith.constant 0 : index
    %c0_1 = arith.constant 0 : index
    %0 = vector.load %arg3[%c0, %c0_0, %c0_1] : memref<9x8x4xf32, #tpu.memory_space<vmem>>, vector<1x8x4xf32>
    %1 = vector.shape_cast %0 : vector<1x8x4xf32> to vector<8x4xf32>
    %c0_2 = arith.constant 0 : index
    %c0_3 = arith.constant 0 : index
    %c0_4 = arith.constant 0 : index
    %2 = vector.load %arg1[%c0_2, %c0_3, %c0_4] : memref<1x4x342xf32, #tpu.memory_space<vmem>>, vector<1x4x288xf32>
    %3 = vector.shape_cast %2 : vector<1x4x288xf32> to vector<4x288xf32>
    %c0_5 = arith.constant 0 : index
    %c0_6 = arith.constant 0 : index
    %c0_7 = arith.constant 0 : index
    %4 = vector.load %arg2[%c0_5, %c0_6, %c0_7] : memref<1x4x342xf32, #tpu.memory_space<vmem>>, vector<1x4x288xf32>
    %5 = vector.shape_cast %4 : vector<1x4x288xf32> to vector<4x288xf32>
    %cst = arith.constant dense<0.000000e+00> : vector<8x288xf32>
    %6 = tpu.matmul %1, %3, %cst {dimension_numbers = #tpu.dot_dimension_numbers<[1], [0], [0], [1], [0, 0, 1, 1], [], []>} : vector<8x4xf32>, vector<4x288xf32>, vector<8x288xf32> -> vector<8x288xf32>
    %cst_8 = arith.constant dense<0.000000e+00> : vector<8x288xf32>
    %7 = tpu.matmul %1, %5, %cst_8 {dimension_numbers = #tpu.dot_dimension_numbers<[1], [0], [0], [1], [0, 0, 1, 1], [], []>} : vector<8x4xf32>, vector<4x288xf32>, vector<8x288xf32> -> vector<8x288xf32>
    %c1 = arith.constant 1 : index
    %c0_9 = arith.constant 0 : index
    %c0_10 = arith.constant 0 : index
    %8 = vector.load %arg3[%c1, %c0_9, %c0_10] : memref<9x8x4xf32, #tpu.memory_space<vmem>>, vector<1x8x4xf32>
    %9 = vector.shape_cast %8 : vector<1x8x4xf32> to vector<8x4xf32>
    %c0_11 = arith.constant 0 : index
    %c0_12 = arith.constant 0 : index
    %c1_13 = arith.constant 1 : index
    %10 = vector.load %arg1[%c0_11, %c0_12, %c1_13] : memref<1x4x342xf32, #tpu.memory_space<vmem>>, vector<1x4x288xf32>
    %11 = vector.shape_cast %10 : vector<1x4x288xf32> to vector<4x288xf32>
    %c0_14 = arith.constant 0 : index
    %c0_15 = arith.constant 0 : index
    %c1_16 = arith.constant 1 : index
    %12 = vector.load %arg2[%c0_14, %c0_15, %c1_16] : memref<1x4x342xf32, #tpu.memory_space<vmem>>, vector<1x4x288xf32>
    %13 = vector.shape_cast %12 : vector<1x4x288xf32> to vector<4x288xf32>
    %cst_17 = arith.constant dense<0.000000e+00> : vector<8x288xf32>
    %14 = tpu.matmul %9, %11, %cst_17 {dimension_numbers = #tpu.dot_dimension_numbers<[1], [0], [0], [1], [0, 0, 1, 1], [], []>} : vector<8x4xf32>, vector<4x288xf32>, vector<8x288xf32> -> vector<8x288xf32>
    %cst_18 = arith.constant dense<0.000000e+00> : vector<8x288xf32>
    %15 = tpu.matmul %9, %13, %cst_18 {dimension_numbers = #tpu.dot_dimension_numbers<[1], [0], [0], [1], [0, 0, 1, 1], [], []>} : vector<8x4xf32>, vector<4x288xf32>, vector<8x288xf32> -> vector<8x288xf32>
    %16 = arith.addf %6, %14 : vector<8x288xf32>
    %17 = arith.addf %7, %15 : vector<8x288xf32>
    %c2 = arith.constant 2 : index
    %c0_19 = arith.constant 0 : index
    %c0_20 = arith.constant 0 : index
    %18 = vector.load %arg3[%c2, %c0_19, %c0_20] : memref<9x8x4xf32, #tpu.memory_space<vmem>>, vector<1x8x4xf32>
    %19 = vector.shape_cast %18 : vector<1x8x4xf32> to vector<8x4xf32>
    %c0_21 = arith.constant 0 : index
    %c0_22 = arith.constant 0 : index
    %c2_23 = arith.constant 2 : index
    %20 = vector.load %arg1[%c0_21, %c0_22, %c2_23] : memref<1x4x342xf32, #tpu.memory_space<vmem>>, vector<1x4x288xf32>
    %21 = vector.shape_cast %20 : vector<1x4x288xf32> to vector<4x288xf32>
    %c0_24 = arith.constant 0 : index
    %c0_25 = arith.constant 0 : index
    %c2_26 = arith.constant 2 : index
    %22 = vector.load %arg2[%c0_24, %c0_25, %c2_26] : memref<1x4x342xf32, #tpu.memory_space<vmem>>, vector<1x4x288xf32>
    %23 = vector.shape_cast %22 : vector<1x4x288xf32> to vector<4x288xf32>
    %cst_27 = arith.constant dense<0.000000e+00> : vector<8x288xf32>
    %24 = tpu.matmul %19, %21, %cst_27 {dimension_numbers = #tpu.dot_dimension_numbers<[1], [0], [0], [1], [0, 0, 1, 1], [], []>} : vector<8x4xf32>, vector<4x288xf32>, vector<8x288xf32> -> vector<8x288xf32>
    %cst_28 = arith.constant dense<0.000000e+00> : vector<8x288xf32>
    %25 = tpu.matmul %19, %23, %cst_28 {dimension_numbers = #tpu.dot_dimension_numbers<[1], [0], [0], [1], [0, 0, 1, 1], [], []>} : vector<8x4xf32>, vector<4x288xf32>, vector<8x288xf32> -> vector<8x288xf32>
    %26 = arith.addf %16, %24 : vector<8x288xf32>
    %27 = arith.addf %17, %25 : vector<8x288xf32>
    %c3 = arith.constant 3 : index
    %c0_29 = arith.constant 0 : index
    %c0_30 = arith.constant 0 : index
    %28 = vector.load %arg3[%c3, %c0_29, %c0_30] : memref<9x8x4xf32, #tpu.memory_space<vmem>>, vector<1x8x4xf32>
    %29 = vector.shape_cast %28 : vector<1x8x4xf32> to vector<8x4xf32>
    %c0_31 = arith.constant 0 : index
    %c0_32 = arith.constant 0 : index
    %c18 = arith.constant 18 : index
    %30 = vector.load %arg1[%c0_31, %c0_32, %c18] : memref<1x4x342xf32, #tpu.memory_space<vmem>>, vector<1x4x288xf32>
    %31 = vector.shape_cast %30 : vector<1x4x288xf32> to vector<4x288xf32>
    %c0_33 = arith.constant 0 : index
    %c0_34 = arith.constant 0 : index
    %c18_35 = arith.constant 18 : index
    %32 = vector.load %arg2[%c0_33, %c0_34, %c18_35] : memref<1x4x342xf32, #tpu.memory_space<vmem>>, vector<1x4x288xf32>
    %33 = vector.shape_cast %32 : vector<1x4x288xf32> to vector<4x288xf32>
    %cst_36 = arith.constant dense<0.000000e+00> : vector<8x288xf32>
    %34 = tpu.matmul %29, %31, %cst_36 {dimension_numbers = #tpu.dot_dimension_numbers<[1], [0], [0], [1], [0, 0, 1, 1], [], []>} : vector<8x4xf32>, vector<4x288xf32>, vector<8x288xf32> -> vector<8x288xf32>
    %cst_37 = arith.constant dense<0.000000e+00> : vector<8x288xf32>
    %35 = tpu.matmul %29, %33, %cst_37 {dimension_numbers = #tpu.dot_dimension_numbers<[1], [0], [0], [1], [0, 0, 1, 1], [], []>} : vector<8x4xf32>, vector<4x288xf32>, vector<8x288xf32> -> vector<8x288xf32>
    %36 = arith.addf %26, %34 : vector<8x288xf32>
    %37 = arith.addf %27, %35 : vector<8x288xf32>
    %c4 = arith.constant 4 : index
    %c0_38 = arith.constant 0 : index
    %c0_39 = arith.constant 0 : index
    %38 = vector.load %arg3[%c4, %c0_38, %c0_39] : memref<9x8x4xf32, #tpu.memory_space<vmem>>, vector<1x8x4xf32>
    %39 = vector.shape_cast %38 : vector<1x8x4xf32> to vector<8x4xf32>
    %c0_40 = arith.constant 0 : index
    %c0_41 = arith.constant 0 : index
    %c19 = arith.constant 19 : index
    %40 = vector.load %arg1[%c0_40, %c0_41, %c19] : memref<1x4x342xf32, #tpu.memory_space<vmem>>, vector<1x4x288xf32>
    %41 = vector.shape_cast %40 : vector<1x4x288xf32> to vector<4x288xf32>
    %c0_42 = arith.constant 0 : index
    %c0_43 = arith.constant 0 : index
    %c19_44 = arith.constant 19 : index
    %42 = vector.load %arg2[%c0_42, %c0_43, %c19_44] : memref<1x4x342xf32, #tpu.memory_space<vmem>>, vector<1x4x288xf32>
    %43 = vector.shape_cast %42 : vector<1x4x288xf32> to vector<4x288xf32>
    %cst_45 = arith.constant dense<0.000000e+00> : vector<8x288xf32>
    %44 = tpu.matmul %39, %41, %cst_45 {dimension_numbers = #tpu.dot_dimension_numbers<[1], [0], [0], [1], [0, 0, 1, 1], [], []>} : vector<8x4xf32>, vector<4x288xf32>, vector<8x288xf32> -> vector<8x288xf32>
    %cst_46 = arith.constant dense<0.000000e+00> : vector<8x288xf32>
    %45 = tpu.matmul %39, %43, %cst_46 {dimension_numbers = #tpu.dot_dimension_numbers<[1], [0], [0], [1], [0, 0, 1, 1], [], []>} : vector<8x4xf32>, vector<4x288xf32>, vector<8x288xf32> -> vector<8x288xf32>
    %46 = arith.addf %36, %44 : vector<8x288xf32>
    %47 = arith.addf %37, %45 : vector<8x288xf32>
    %c5 = arith.constant 5 : index
    %c0_47 = arith.constant 0 : index
    %c0_48 = arith.constant 0 : index
    %48 = vector.load %arg3[%c5, %c0_47, %c0_48] : memref<9x8x4xf32, #tpu.memory_space<vmem>>, vector<1x8x4xf32>
    %49 = vector.shape_cast %48 : vector<1x8x4xf32> to vector<8x4xf32>
    %c0_49 = arith.constant 0 : index
    %c0_50 = arith.constant 0 : index
    %c20 = arith.constant 20 : index
    %50 = vector.load %arg1[%c0_49, %c0_50, %c20] : memref<1x4x342xf32, #tpu.memory_space<vmem>>, vector<1x4x288xf32>
    %51 = vector.shape_cast %50 : vector<1x4x288xf32> to vector<4x288xf32>
    %c0_51 = arith.constant 0 : index
    %c0_52 = arith.constant 0 : index
    %c20_53 = arith.constant 20 : index
    %52 = vector.load %arg2[%c0_51, %c0_52, %c20_53] : memref<1x4x342xf32, #tpu.memory_space<vmem>>, vector<1x4x288xf32>
    %53 = vector.shape_cast %52 : vector<1x4x288xf32> to vector<4x288xf32>
    %cst_54 = arith.constant dense<0.000000e+00> : vector<8x288xf32>
    %54 = tpu.matmul %49, %51, %cst_54 {dimension_numbers = #tpu.dot_dimension_numbers<[1], [0], [0], [1], [0, 0, 1, 1], [], []>} : vector<8x4xf32>, vector<4x288xf32>, vector<8x288xf32> -> vector<8x288xf32>
    %cst_55 = arith.constant dense<0.000000e+00> : vector<8x288xf32>
    %55 = tpu.matmul %49, %53, %cst_55 {dimension_numbers = #tpu.dot_dimension_numbers<[1], [0], [0], [1], [0, 0, 1, 1], [], []>} : vector<8x4xf32>, vector<4x288xf32>, vector<8x288xf32> -> vector<8x288xf32>
    %56 = arith.addf %46, %54 : vector<8x288xf32>
    %57 = arith.addf %47, %55 : vector<8x288xf32>
    %c6 = arith.constant 6 : index
    %c0_56 = arith.constant 0 : index
    %c0_57 = arith.constant 0 : index
    %58 = vector.load %arg3[%c6, %c0_56, %c0_57] : memref<9x8x4xf32, #tpu.memory_space<vmem>>, vector<1x8x4xf32>
    %59 = vector.shape_cast %58 : vector<1x8x4xf32> to vector<8x4xf32>
    %c0_58 = arith.constant 0 : index
    %c0_59 = arith.constant 0 : index
    %c36 = arith.constant 36 : index
    %60 = vector.load %arg1[%c0_58, %c0_59, %c36] : memref<1x4x342xf32, #tpu.memory_space<vmem>>, vector<1x4x288xf32>
    %61 = vector.shape_cast %60 : vector<1x4x288xf32> to vector<4x288xf32>
    %c0_60 = arith.constant 0 : index
    %c0_61 = arith.constant 0 : index
    %c36_62 = arith.constant 36 : index
    %62 = vector.load %arg2[%c0_60, %c0_61, %c36_62] : memref<1x4x342xf32, #tpu.memory_space<vmem>>, vector<1x4x288xf32>
    %63 = vector.shape_cast %62 : vector<1x4x288xf32> to vector<4x288xf32>
    %cst_63 = arith.constant dense<0.000000e+00> : vector<8x288xf32>
    %64 = tpu.matmul %59, %61, %cst_63 {dimension_numbers = #tpu.dot_dimension_numbers<[1], [0], [0], [1], [0, 0, 1, 1], [], []>} : vector<8x4xf32>, vector<4x288xf32>, vector<8x288xf32> -> vector<8x288xf32>
    %cst_64 = arith.constant dense<0.000000e+00> : vector<8x288xf32>
    %65 = tpu.matmul %59, %63, %cst_64 {dimension_numbers = #tpu.dot_dimension_numbers<[1], [0], [0], [1], [0, 0, 1, 1], [], []>} : vector<8x4xf32>, vector<4x288xf32>, vector<8x288xf32> -> vector<8x288xf32>
    %66 = arith.addf %56, %64 : vector<8x288xf32>
    %67 = arith.addf %57, %65 : vector<8x288xf32>
    %c7 = arith.constant 7 : index
    %c0_65 = arith.constant 0 : index
    %c0_66 = arith.constant 0 : index
    %68 = vector.load %arg3[%c7, %c0_65, %c0_66] : memref<9x8x4xf32, #tpu.memory_space<vmem>>, vector<1x8x4xf32>
    %69 = vector.shape_cast %68 : vector<1x8x4xf32> to vector<8x4xf32>
    %c0_67 = arith.constant 0 : index
    %c0_68 = arith.constant 0 : index
    %c37 = arith.constant 37 : index
    %70 = vector.load %arg1[%c0_67, %c0_68, %c37] : memref<1x4x342xf32, #tpu.memory_space<vmem>>, vector<1x4x288xf32>
    %71 = vector.shape_cast %70 : vector<1x4x288xf32> to vector<4x288xf32>
    %c0_69 = arith.constant 0 : index
    %c0_70 = arith.constant 0 : index
    %c37_71 = arith.constant 37 : index
    %72 = vector.load %arg2[%c0_69, %c0_70, %c37_71] : memref<1x4x342xf32, #tpu.memory_space<vmem>>, vector<1x4x288xf32>
    %73 = vector.shape_cast %72 : vector<1x4x288xf32> to vector<4x288xf32>
    %cst_72 = arith.constant dense<0.000000e+00> : vector<8x288xf32>
    %74 = tpu.matmul %69, %71, %cst_72 {dimension_numbers = #tpu.dot_dimension_numbers<[1], [0], [0], [1], [0, 0, 1, 1], [], []>} : vector<8x4xf32>, vector<4x288xf32>, vector<8x288xf32> -> vector<8x288xf32>
    %cst_73 = arith.constant dense<0.000000e+00> : vector<8x288xf32>
    %75 = tpu.matmul %69, %73, %cst_73 {dimension_numbers = #tpu.dot_dimension_numbers<[1], [0], [0], [1], [0, 0, 1, 1], [], []>} : vector<8x4xf32>, vector<4x288xf32>, vector<8x288xf32> -> vector<8x288xf32>
    %76 = arith.addf %66, %74 : vector<8x288xf32>
    %77 = arith.addf %67, %75 : vector<8x288xf32>
    %c8 = arith.constant 8 : index
    %c0_74 = arith.constant 0 : index
    %c0_75 = arith.constant 0 : index
    %78 = vector.load %arg3[%c8, %c0_74, %c0_75] : memref<9x8x4xf32, #tpu.memory_space<vmem>>, vector<1x8x4xf32>
    %79 = vector.shape_cast %78 : vector<1x8x4xf32> to vector<8x4xf32>
    %c0_76 = arith.constant 0 : index
    %c0_77 = arith.constant 0 : index
    %c38 = arith.constant 38 : index
    %80 = vector.load %arg1[%c0_76, %c0_77, %c38] : memref<1x4x342xf32, #tpu.memory_space<vmem>>, vector<1x4x288xf32>
    %81 = vector.shape_cast %80 : vector<1x4x288xf32> to vector<4x288xf32>
    %c0_78 = arith.constant 0 : index
    %c0_79 = arith.constant 0 : index
    %c38_80 = arith.constant 38 : index
    %82 = vector.load %arg2[%c0_78, %c0_79, %c38_80] : memref<1x4x342xf32, #tpu.memory_space<vmem>>, vector<1x4x288xf32>
    %83 = vector.shape_cast %82 : vector<1x4x288xf32> to vector<4x288xf32>
    %cst_81 = arith.constant dense<0.000000e+00> : vector<8x288xf32>
    %84 = tpu.matmul %79, %81, %cst_81 {dimension_numbers = #tpu.dot_dimension_numbers<[1], [0], [0], [1], [0, 0, 1, 1], [], []>} : vector<8x4xf32>, vector<4x288xf32>, vector<8x288xf32> -> vector<8x288xf32>
    %cst_82 = arith.constant dense<0.000000e+00> : vector<8x288xf32>
    %85 = tpu.matmul %79, %83, %cst_82 {dimension_numbers = #tpu.dot_dimension_numbers<[1], [0], [0], [1], [0, 0, 1, 1], [], []>} : vector<8x4xf32>, vector<4x288xf32>, vector<8x288xf32> -> vector<8x288xf32>
    %86 = arith.addf %76, %84 : vector<8x288xf32>
    %87 = arith.addf %77, %85 : vector<8x288xf32>
    %c0_83 = arith.constant 0 : index
    %c0_84 = arith.constant 0 : index
    %88 = vector.load %arg4[%c0_83, %c0_84] : memref<8x1xf32, #tpu.memory_space<vmem>>, vector<8x1xf32>
    %c0_85 = arith.constant 0 : index
    %c0_86 = arith.constant 0 : index
    %89 = vector.load %arg5[%c0_85, %c0_86] : memref<8x1xf32, #tpu.memory_space<vmem>>, vector<8x1xf32>
    %90 = vector.broadcast %88 : vector<8x1xf32> to vector<8x288xf32>
    %91 = arith.addf %87, %90 : vector<8x288xf32>
    %92 = arith.subf %86, %87 : vector<8x288xf32>
    %93 = vector.broadcast %89 : vector<8x1xf32> to vector<8x288xf32>
    %94 = arith.mulf %93, %92 : vector<8x288xf32>
    %95 = arith.addf %91, %94 : vector<8x288xf32>
    %c0_87 = arith.constant 0 : index
    %c0_88 = arith.constant 0 : index
    %c0_89 = arith.constant 0 : index
    %c0_90 = arith.constant 0 : index
    %96 = vector.load %arg6[%c0_87, %c0_88, %c0_89, %c0_90] : memref<2x1x8x288xf32, #tpu.memory_space<vmem>>, vector<1x1x8x288xf32>
    %97 = vector.shape_cast %96 : vector<1x1x8x288xf32> to vector<8x288xf32>
    %98 = vector.shape_cast %95 : vector<8x288xf32> to vector<1x1x8x288xf32>
    tpu.vector_store %arg6[%c0_87, %c0_88, %c0_89, %c0_90], %98 {strides = array<i32>} : memref<2x1x8x288xf32, #tpu.memory_space<vmem>>, vector<1x1x8x288xf32>,
    %c1_91 = arith.constant 1 : index
    %c0_92 = arith.constant 0 : index
    %c0_93 = arith.constant 0 : index
    %c0_94 = arith.constant 0 : index
    %99 = vector.load %arg6[%c1_91, %c0_92, %c0_93, %c0_94] : memref<2x1x8x288xf32, #tpu.memory_space<vmem>>, vector<1x1x8x288xf32>
    %100 = vector.shape_cast %99 : vector<1x1x8x288xf32> to vector<8x288xf32>
    %101 = vector.shape_cast %91 : vector<8x288xf32> to vector<1x1x8x288xf32>
    tpu.vector_store %arg6[%c1_91, %c0_92, %c0_93, %c0_94], %101 {strides = array<i32>} : memref<2x1x8x288xf32, #tpu.memory_space<vmem>>, vector<1x1x8x288xf32>,
    return
  }
  func.func @transform_0(%arg0: i32) -> (i32, i32, i32) {
    %c0_i32 = arith.constant 0 : i32
    %c0_i32_0 = arith.constant 0 : i32
    %c0_i32_1 = arith.constant 0 : i32
    return %arg0, %c0_i32, %c0_i32_0 : i32, i32, i32
  }
  func.func @transform_1(%arg0: i32) -> (i32, i32, i32) {
    %c1_i32 = arith.constant 1 : i32
    %0 = arith.addi %arg0, %c1_i32 : i32
    %c0_i32 = arith.constant 0 : i32
    %c0_i32_0 = arith.constant 0 : i32
    %c0_i32_1 = arith.constant 0 : i32
    return %0, %c0_i32, %c0_i32_0 : i32, i32, i32
  }
  func.func @transform_2(%arg0: i32) -> (i32, i32, i32) {
    %c0_i32 = arith.constant 0 : i32
    %c0_i32_0 = arith.constant 0 : i32
    %c0_i32_1 = arith.constant 0 : i32
    %c0_i32_2 = arith.constant 0 : i32
    return %c0_i32, %c0_i32_0, %c0_i32_1 : i32, i32, i32
  }
  func.func @transform_3(%arg0: i32) -> (i32, i32) {
    %c0_i32 = arith.constant 0 : i32
    %c0_i32_0 = arith.constant 0 : i32
    %c0_i32_1 = arith.constant 0 : i32
    return %c0_i32, %c0_i32_0 : i32, i32
  }
  func.func @transform_4(%arg0: i32) -> (i32, i32) {
    %c0_i32 = arith.constant 0 : i32
    %c0_i32_0 = arith.constant 0 : i32
    %c0_i32_1 = arith.constant 0 : i32
    return %c0_i32, %c0_i32_0 : i32, i32
  }
  func.func @transform_5(%arg0: i32) -> (i32, i32, i32, i32) {
    %c0_i32 = arith.constant 0 : i32
    %c0_i32_0 = arith.constant 0 : i32
    %c0_i32_1 = arith.constant 0 : i32
    %c0_i32_2 = arith.constant 0 : i32
    return %c0_i32, %arg0, %c0_i32_0, %c0_i32_1 : i32, i32, i32, i32
  }
}

</mosaic_0001>

<bundles_post_ra>
// kernel: kf_conv2d_forward.1
= control target key start
LH: loop header
LB: loop body
LE: loop exit
PB: predicated region body
PF: predicated region fallthrough
CT: control target
= control target key end

     0   :  { %v3354_v3 = vmov 0.0   ;;  %vm3355_vm0 = vmmov 0   ;;  %s3356_s24 = smov 127   ;;  %s3357_s29 = smov 126   ;;  %v3363_v20 = vmov 0   ;;  %vm63_vm1 = vcmask 1043456   ;;  %s3748_s0 = inlined_call_operand.vmem [shape: f32[2,4,342], index: 0, kind: input, shape index: {}, may-alias: {0,1}]   ;;  %s3749_s1 = inlined_call_operand.vmem [shape: f32[2,4,342], index: 1, kind: input, shape index: {}, may-alias: {0,1}]   ;;  %s3750_s3 = inlined_call_operand.vmem [shape: f32[8,1], index: 3, kind: input, shape index: {}]   ;;  %s3751_s4 = inlined_call_operand.vmem [shape: f32[8,1], index: 4, kind: input, shape index: {}]   ;;  %s3752_s2 = inlined_call_operand.vmem [shape: f32[9,8,4], index: 2, kind: input, shape index: {}]   ;;  %s3753_s5 = inlined_call_operand.vmem [shape: f32[2,1,8,288], index: 5, kind: output, shape index: {}]  }
   0x1   :  { %v3398_v0 = vld [vmem:[%s3748_s0 + $0x8] sm:$0xf]  ;;  %v3403_v1 = vld [vmem:[%s3748_s0] sm:$0xff]  ;;  %v3408_v2 = vld [vmem:[%s3749_s1 + $0xc] sm:$0xff]  ;;  %3185 = vmatprep.subr.mxu1 %v3354_v3  ;;  %3187 = vmatprep.mubr.msk.f32.mxu1 %vm3355_vm0, %v3354_v3  ;;  %s3358_s9 = smov 110   ;;  %s3359_s14 = smov 109  }
   0x2   :  { %54 = vrot.lane.b32.xlu0 %v3398_v0, %s3356_s24  ;;  %50 = vrot.lane.b32.xlu1 %v3403_v1, %s3356_s24  ;;  %v3417_v4 = vcombine.high %v3408_v2, %v3408_v2  ;;  %v3421_v5 = vcombine.high %v3403_v1, %v3403_v1  ;;  %v3429_v6 = vld [vmem:[%s3749_s1 + $0x14] sm:$0xf]  ;;  %v669_v7 = vld [vmem:[%s3748_s0 + $0x8] sm:$0xf]  ;;  %s3360_s19 = smov 108   ;;  %vm59_vm2 = vcmask 31744  }
   0x3   :  { %134 = vmatprep.mubr.f32.mxu0 %v3354_v3  ;;  %v3057_v8 = vld [vmem:[%s3749_s1 + $0x14] sm:$0xf]  ;;  %v1001_v9 = vld [vmem:[%s3748_s0 + $0x8] sm:$0xf]  ;;  %3350 = vset.pattern.permute.xlu0 %v3363_v20  ;;  %v2990_v22 = vld [vmem:[%s3750_s3] sm:$0xff]  ;;  %vm56_vm3 = vcmask 1039360  }
   0x4   :  { %v3070_v10 = vld [vmem:[%s3749_s1 + $0x14] sm:$0xf]  ;;  %v1333_v11 = vld [vmem:[%s3748_s0 + $0x8] sm:$0xf]  ;;  %3351 = vset.pattern.permute.xlu1 %v3363_v20  ;;  %v2991_v23 = vld [vmem:[%s3751_s4] sm:$0xff]  ;;  %vm681_vm4 = vcmask 1031168  }
   0x5   :  { %v3083_v12 = vld [vmem:[%s3749_s1 + $0x14] sm:$0xf]  ;;  %v1665_v13 = vld [vmem:[%s3748_s0 + $0x8] sm:$0xf]  ;;  %v40_v35 = vld [vmem:[%s3752_s2] sm:$0xff]  ;;  %vm1013_vm5 = vcmask 900096  }
   0x6   :  { %216 = vrot.lane.b32.xlu1 %v3417_v4, %s3356_s24  ;;  %52 = vrot.lane.b32.xlu0 %v3421_v5, %s3356_s24  ;;  %v3096_v14 = vld [vmem:[%s3749_s1 + $0x14] sm:$0xf]  ;;  %v1997_v15 = vld [vmem:[%s3748_s0 + $0x8] sm:$0xf]  ;;  %vm1345_vm6 = vcmask 891904   ;;  %vm1677_vm7 = vcmask 883712  }
   0x7   :  { %v3109_v16 = vld [vmem:[%s3749_s1 + $0x14] sm:$0xf]  ;;  %v2329_v17 = vld [vmem:[%s3748_s0 + $0x8] sm:$0xf]  ;;  %v3068_v52 = vld [vmem:[%s3752_s2 + $0x18] sm:$0xff]  ;;  %vm2009_vm8 = vcmask 752640  }
   0x8   :  { %v3122_v18 = vld [vmem:[%s3749_s1 + $0x14] sm:$0xf]  ;;  %v2661_v19 = vld [vmem:[%s3748_s0 + $0x8] sm:$0xf]  ;;  %v3081_v60 = vld [vmem:[%s3752_s2 + $0x20] sm:$0xff]  ;;  %vm2341_vm9 = vcmask 744448  }
   0x9   :  { %v3135_v21 = vld [vmem:[%s3749_s1 + $0x14] sm:$0xf]  ;;  %v3034_v24 = vld [vmem:[%s3752_s2 + $0x8] sm:$0xff]  ;;  %vm2673_vm10 = vcmask 736256   ;;  %vm3016_vm11 = vcmask 261120  }
   0xa   :  { %214 = vrot.lane.b32.xlu1 %v3408_v2, %s3356_s24  ;;  %218 = vrot.lane.b32.xlu0 %v3429_v6, %s3356_s24  ;;  %s3361_s24 = smov 92   ;;  %v3055_v43 = vld [vmem:[%s3752_s2 + $0x10] sm:$0xff] }
   0xe   :  { %679 = vrot.lane.b32.xlu1 %v669_v7, %s3357_s29  ;;  %677 = vrot.lane.b32.xlu0 %v3421_v5, %s3357_s29 }
  0x12   :  { %839 = vrot.lane.b32.xlu1 %v3417_v4, %s3357_s29  ;;  %675 = vrot.lane.b32.xlu0 %v3403_v1, %s3357_s29 }
  0x16   :  { %837 = vrot.lane.b32.xlu1 %v3408_v2, %s3357_s29  ;;  %841 = vrot.lane.b32.xlu0 %v3057_v8, %s3357_s29  ;;  %s3362_s29 = smov 91   ;;  %v3094_v8 = vld [vmem:[%s3752_s2 + $0x28] sm:$0xff] }
  0x1a   :  { %1011 = vrot.lane.b32.xlu1 %v1001_v9, %s3358_s9  ;;  %1009 = vrot.lane.b32.xlu0 %v3421_v5, %s3358_s9 }
  0x1e   :  { %1171 = vrot.lane.b32.xlu1 %v3417_v4, %s3358_s9  ;;  %1007 = vrot.lane.b32.xlu0 %v3403_v1, %s3358_s9 }
  0x22   :  { %1169 = vrot.lane.b32.xlu1 %v3408_v2, %s3358_s9  ;;  %1173 = vrot.lane.b32.xlu0 %v3070_v10, %s3358_s9  ;;  %s3364_s9 = smov 90  }
  0x26   :  { %1343 = vrot.lane.b32.xlu1 %v1333_v11, %s3359_s14  ;;  %1341 = vrot.lane.b32.xlu0 %v3421_v5, %s3359_s14 }
  0x2a   :  { %1503 = vrot.lane.b32.xlu1 %v3417_v4, %s3359_s14  ;;  %1339 = vrot.lane.b32.xlu0 %v3403_v1, %s3359_s14 }
  0x2e   :  { %1501 = vrot.lane.b32.xlu1 %v3408_v2, %s3359_s14  ;;  %1505 = vrot.lane.b32.xlu0 %v3083_v12, %s3359_s14 }
  0x32   :  { %1675 = vrot.lane.b32.xlu1 %v1665_v13, %s3360_s19  ;;  %1673 = vrot.lane.b32.xlu0 %v3421_v5, %s3360_s19 }
  0x36   :  { %1835 = vrot.lane.b32.xlu1 %v3417_v4, %s3360_s19  ;;  %1671 = vrot.lane.b32.xlu0 %v3403_v1, %s3360_s19 }
  0x3a   :  { %1833 = vrot.lane.b32.xlu1 %v3408_v2, %s3360_s19  ;;  %1837 = vrot.lane.b32.xlu0 %v3096_v14, %s3360_s19 }
  0x3e   :  { %2007 = vrot.lane.b32.xlu1 %v1997_v15, %s3361_s24  ;;  %2005 = vrot.lane.b32.xlu0 %v3421_v5, %s3361_s24 }
  0x42   :  { %2167 = vrot.lane.b32.xlu1 %v3417_v4, %s3361_s24  ;;  %2003 = vrot.lane.b32.xlu0 %v3403_v1, %s3361_s24 }
  0x46   :  { %2165 = vrot.lane.b32.xlu1 %v3408_v2, %s3361_s24  ;;  %2169 = vrot.lane.b32.xlu0 %v3109_v16, %s3361_s24 }
  0x4a   :  { %2339 = vrot.lane.b32.xlu1 %v2329_v17, %s3362_s29  ;;  %2337 = vrot.lane.b32.xlu0 %v3421_v5, %s3362_s29 }
  0x4e   :  { %2499 = vrot.lane.b32.xlu1 %v3417_v4, %s3362_s29  ;;  %2335 = vrot.lane.b32.xlu0 %v3403_v1, %s3362_s29 }
  0x52   :  { %2497 = vrot.lane.b32.xlu1 %v3408_v2, %s3362_s29  ;;  %2501 = vrot.lane.b32.xlu0 %v3122_v18, %s3362_s29 }
  0x56   :  { %2671 = vrot.lane.b32.xlu1 %v2661_v19, %s3364_s9  ;;  %2669 = vrot.lane.b32.xlu0 %v3421_v5, %s3364_s9  ;;  %v3107_v19 = vld [vmem:[%s3752_s2 + $0x30] sm:$0xff] }
  0x5a   :  { %2831 = vrot.lane.b32.xlu1 %v3417_v4, %s3364_s9  ;;  %2667 = vrot.lane.b32.xlu0 %v3403_v1, %s3364_s9 }
  0x5e   :  { %2829 = vrot.lane.b32.xlu1 %v3408_v2, %s3364_s9  ;;  %2833 = vrot.lane.b32.xlu0 %v3135_v21, %s3364_s9 }
  0x62   :  { %2994 = vperm.xlu0 %3350, %v2990_v22   ;;  %3005 = vperm.xlu1 %3351, %v2991_v23  }
  0x74   :  { %v55_v25 = vpop.permute.xlu0 %54  ;;  %v51_v26 = vpop.permute.xlu1 %50 }
  0x75   :  { %3186 = vmatpush3.msk.msra.mxu1 %vm63_vm1, %v55_v25 }
  0x76   :  { %3188 = vmatmul.mubr.msk.f32.vlgmr.msra.gmra.mrb[0].mxu1 %vm59_vm2, %v3034_v24  ;;  %3190 = vmatprep.subr.mxu1 %v3354_v3 }
  0x77   :  { %3192 = vmatprep.mubr.msk.f32.mxu1 %vm3355_vm0, %v3354_v3 }
  0x78   :  { %v217_v27 = vpop.permute.xlu1 %216  ;;  %v53_v28 = vpop.permute.xlu0 %52 }
  0x79   :  { %v58_v29 = vsel %vm56_vm3, %v53_v28, %v55_v25  ;;  %v57_v30 = vsel %vm56_vm3, %v51_v26, %v53_v28 }
  0x7a   :  { %3035 = vmatprep.subr.msk.mxu0 %vm63_vm1, %v58_v29 }
  0x7b   :  { %3036 = vmatpush1.msk.msra.mxu0 %vm63_vm1, %v57_v30  ;;  %v3120_v30 = vld [vmem:[%s3752_s2 + $0x38] sm:$0xff] }
  0x7c   :  { %v215_v31 = vpop.permute.xlu1 %214  ;;  %3037 = vmatmul.mubr.msk.f32.vlgmr.msra.gmra.mrb[0].mxu0 %vm59_vm2, %v3034_v24  ;;  %v219_v32 = vpop.permute.xlu0 %218 }
  0x7d   :  { %v220_v33 = vsel %vm56_vm3, %v215_v31, %v217_v27  ;;  %v221_v34 = vsel %vm56_vm3, %v217_v27, %v219_v32  ;;  %3191 = vmatpush3.msk.msra.mxu1 %vm63_vm1, %v219_v32  ;;  %292 = vmatprep.mubr.f32.mxu0 %v3354_v3 }
  0x7e   :  { %3040 = vmatprep.subr.msk.mxu0 %vm63_vm1, %v221_v34  ;;  %3193 = vmatmul.mubr.msk.f32.vlgmr.msra.gmra.mrb[2].mxu1 %vm59_vm2, %v3034_v24 }
  0x7f   :  { %3041 = vmatpush1.msk.msra.mxu0 %vm63_vm1, %v220_v33  ;;  %3195 = vmatprep.subr.mxu1 %v3354_v3 }
  0x80   :  { %v680_v36 = vpop.permute.xlu1 %679  ;;  %3042 = vmatmul.mubr.msk.f32.vlgmr.msra.gmra.mrb[2].mxu0 %vm59_vm2, %v3034_v24  ;;  %v678_v37 = vpop.permute.xlu0 %677  ;;  %3045 = vmatprep.subr.msk.mxu0 %vm63_vm1, %v3421_v5 }
  0x81   :  { %3196 = vmatpush3.msk.msra.mxu1 %vm63_vm1, %v3398_v0  ;;  %3197 = vmatprep.mubr.msk.f32.mxu1 %vm3355_vm0, %v3354_v3  ;;  %v683_v40 = vsel %vm681_vm4, %v678_v37, %v680_v36 }
  0x82   :  { %3046 = vmatpush1.msk.msra.mxu0 %vm63_vm1, %v3403_v1  ;;  %3198 = vmatmul.mubr.msk.f32.vlgmr.msra.gmra.mrb[0].mxu1 %vm59_vm2, %v40_v35 }
  0x83   :  { %442 = vmatprep.mubr.f32.mxu0 %v3354_v3  ;;  %3050 = vmatprep.subr.msk.mxu0 %vm63_vm1, %v3417_v4 }
  0x84   :  { %3200 = vmatprep.subr.mxu1 %v3354_v3  ;;  %v840_v38 = vpop.permute.xlu1 %839  ;;  %3047 = vmatmul.mubr.msk.f32.vlgmr.msra.gmra.mrb[0].mxu0 %vm59_vm2, %v40_v35  ;;  %v676_v39 = vpop.permute.xlu0 %675 }
  0x85   :  { %3051 = vmatpush1.msk.msra.mxu0 %vm63_vm1, %v3408_v2  ;;  %3201 = vmatpush3.msk.msra.mxu1 %vm63_vm1, %v3429_v6  ;;  %v682_v44 = vsel %vm681_vm4, %v676_v39, %v678_v37  ;;  %v3133_v39 = vld [vmem:[%s3752_s2 + $0x40] sm:$0xff] }
  0x86   :  { %3202 = vmatprep.mubr.msk.f32.mxu1 %vm3355_vm0, %v3354_v3  ;;  %3058 = vmatprep.subr.msk.mxu0 %vm63_vm1, %v683_v40 }
  0x87   :  { %3205 = vmatprep.subr.mxu1 %v3354_v3  ;;  %3203 = vmatmul.mubr.msk.f32.vlgmr.msra.gmra.mrb[2].mxu1 %vm59_vm2, %v40_v35 }
  0x88   :  { %3206 = vmatpush3.msk.msra.mxu1 %vm63_vm1, %v680_v36  ;;  %589 = vmatprep.mubr.f32.mxu0 %v3354_v3  ;;  %v838_v41 = vpop.permute.xlu1 %837  ;;  %v842_v42 = vpop.permute.xlu0 %841 }
  0x89   :  { %3052 = vmatmul.mubr.msk.f32.vlgmr.msra.gmra.mrb[2].mxu0 %vm59_vm2, %v40_v35  ;;  %v844_v45 = vsel %vm681_vm4, %v840_v38, %v842_v42  ;;  %3207 = vmatprep.mubr.msk.f32.mxu1 %vm3355_vm0, %v3354_v3  ;;  %v843_v48 = vsel %vm681_vm4, %v838_v41, %v840_v38 }
  0x8a   :  { %3059 = vmatpush1.msk.msra.mxu0 %vm63_vm1, %v682_v44  ;;  %3210 = vmatprep.subr.mxu1 %v3354_v3 }
  0x8b   :  { %3208 = vmatmul.mubr.msk.f32.vlgmr.msra.gmra.mrb[0].mxu1 %vm59_vm2, %v3055_v43  ;;  %3063 = vmatprep.subr.msk.mxu0 %vm63_vm1, %v844_v45 }
  0x8c   :  { %3211 = vmatpush3.msk.msra.mxu1 %vm63_vm1, %v842_v42  ;;  %757 = vmatprep.mubr.f32.mxu0 %v3354_v3  ;;  %v1012_v46 = vpop.permute.xlu1 %1011  ;;  %v1010_v47 = vpop.permute.xlu0 %1009 }
  0x8d   :  { %3060 = vmatmul.mubr.msk.f32.vlgmr.msra.gmra.mrb[0].mxu0 %vm59_vm2, %v3055_v43  ;;  %v1015_v49 = vsel %vm1013_vm5, %v1010_v47, %v1012_v46  ;;  %3212 = vmatprep.mubr.msk.f32.mxu1 %vm3355_vm0, %v3354_v3 }
  0x8e   :  { %3064 = vmatpush1.msk.msra.mxu0 %vm63_vm1, %v843_v48  ;;  %3215 = vmatprep.subr.mxu1 %v3354_v3 }
  0x8f   :  { %3213 = vmatmul.mubr.msk.f32.vlgmr.msra.gmra.mrb[2].mxu1 %vm59_vm2, %v3055_v43  ;;  %3071 = vmatprep.subr.msk.mxu0 %vm63_vm1, %v1015_v49 }
  0x90   :  { %3216 = vmatpush3.msk.msra.mxu1 %vm63_vm1, %v1012_v46  ;;  %v1172_v50 = vpop.permute.xlu1 %1171  ;;  %v1008_v51 = vpop.permute.xlu0 %1007  ;;  %915 = vmatprep.mubr.f32.mxu0 %v3354_v3 }
  0x91   :  { %v1014_v53 = vsel %vm1013_vm5, %v1008_v51, %v1010_v47  ;;  %3065 = vmatmul.mubr.msk.f32.vlgmr.msra.gmra.mrb[2].mxu0 %vm59_vm2, %v3055_v43  ;;  %3217 = vmatprep.mubr.msk.f32.mxu1 %vm3355_vm0, %v3354_v3 }
  0x92   :  { %3072 = vmatpush1.msk.msra.mxu0 %vm63_vm1, %v1014_v53  ;;  %3220 = vmatprep.subr.mxu1 %v3354_v3 }
  0x93   :  { %3218 = vmatmul.mubr.msk.f32.vlgmr.msra.gmra.mrb[0].mxu1 %vm59_vm2, %v3068_v52  ;;  %1089 = vmatprep.mubr.f32.mxu0 %v3354_v3 }
  0x94   :  { %v1170_v54 = vpop.permute.xlu1 %1169  ;;  %v1174_v55 = vpop.permute.xlu0 %1173  ;;  %3222 = vmatprep.mubr.msk.f32.mxu1 %vm3355_vm0, %v3354_v3 }
  0x95   :  { %v1175_v56 = vsel %vm1013_vm5, %v1170_v54, %v1172_v50  ;;  %v1176_v57 = vsel %vm1013_vm5, %v1172_v50, %v1174_v55  ;;  %3221 = vmatpush3.msk.msra.mxu1 %vm63_vm1, %v1174_v55  ;;  %3073 = vmatmul.mubr.msk.f32.vlgmr.msra.gmra.mrb[0].mxu0 %vm59_vm2, %v3068_v52 }
  0x96   :  { %3076 = vmatprep.subr.msk.mxu0 %vm63_vm1, %v1176_v57  ;;  %3225 = vmatprep.subr.mxu1 %v3354_v3 }
  0x97   :  { %3077 = vmatpush1.msk.msra.mxu0 %vm63_vm1, %v1175_v56  ;;  %3223 = vmatmul.mubr.msk.f32.vlgmr.msra.gmra.mrb[2].mxu1 %vm59_vm2, %v3068_v52 }
  0x98   :  { %v1344_v58 = vpop.permute.xlu1 %1343  ;;  %v1342_v59 = vpop.permute.xlu0 %1341  ;;  %1247 = vmatprep.mubr.f32.mxu0 %v3354_v3  ;;  %3227 = vmatprep.mubr.msk.f32.mxu1 %vm3355_vm0, %v3354_v3 }
  0x99   :  { %v1347_v61 = vsel %vm1345_vm6, %v1342_v59, %v1344_v58  ;;  %3226 = vmatpush3.msk.msra.mxu1 %vm63_vm1, %v1344_v58  ;;  %3078 = vmatmul.mubr.msk.f32.vlgmr.msra.gmra.mrb[2].mxu0 %vm59_vm2, %v3068_v52 }
  0x9a   :  { %3084 = vmatprep.subr.msk.mxu0 %vm63_vm1, %v1347_v61  ;;  %3230 = vmatprep.subr.mxu1 %v3354_v3 }
  0x9b   :  { %3228 = vmatmul.mubr.msk.f32.vlgmr.msra.gmra.mrb[0].mxu1 %vm59_vm2, %v3081_v60  ;;  %1421 = vmatprep.mubr.f32.mxu0 %v3354_v3 }
  0x9c   :  { %v1504_v62 = vpop.permute.xlu1 %1503  ;;  %v1340_v63 = vpop.permute.xlu0 %1339  ;;  %3232 = vmatprep.mubr.msk.f32.mxu1 %vm3355_vm0, %v3354_v3 }
  0x9d   :  { %v1346_v0 = vsel %vm1345_vm6, %v1340_v63, %v1342_v59 }
  0x9e   :  { %3085 = vmatpush1.msk.msra.mxu0 %vm63_vm1, %v1346_v0 }
  0x9f   :  { %3086 = vmatmul.mubr.msk.f32.vlgmr.msra.gmra.mrb[0].mxu0 %vm59_vm2, %v3081_v60 }
  0xa0   :  { %v1502_v1 = vpop.permute.xlu1 %1501  ;;  %v1506_v2 = vpop.permute.xlu0 %1505  ;;  %1579 = vmatprep.mubr.f32.mxu0 %v3354_v3 }
  0xa1   :  { %v1507_v4 = vsel %vm1345_vm6, %v1502_v1, %v1504_v62  ;;  %v1508_v5 = vsel %vm1345_vm6, %v1504_v62, %v1506_v2  ;;  %3231 = vmatpush3.msk.msra.mxu1 %vm63_vm1, %v1506_v2 }
  0xa2   :  { %3089 = vmatprep.subr.msk.mxu0 %vm63_vm1, %v1508_v5  ;;  %3235 = vmatprep.subr.mxu1 %v3354_v3 }
  0xa3   :  { %3090 = vmatpush1.msk.msra.mxu0 %vm63_vm1, %v1507_v4  ;;  %3233 = vmatmul.mubr.msk.f32.vlgmr.msra.gmra.mrb[2].mxu1 %vm59_vm2, %v3081_v60 }
  0xa4   :  { %v1676_v6 = vpop.permute.xlu1 %1675  ;;  %v1674_v7 = vpop.permute.xlu0 %1673  ;;  %3091 = vmatmul.mubr.msk.f32.vlgmr.msra.gmra.mrb[2].mxu0 %vm59_vm2, %v3081_v60  ;;  %3237 = vmatprep.mubr.msk.f32.mxu1 %vm3355_vm0, %v3354_v3 }
  0xa5   :  { %v1679_v9 = vsel %vm1677_vm7, %v1674_v7, %v1676_v6  ;;  %3236 = vmatpush3.msk.msra.mxu1 %vm63_vm1, %v1676_v6  ;;  %1753 = vmatprep.mubr.f32.mxu0 %v3354_v3 }
  0xa6   :  { %3097 = vmatprep.subr.msk.mxu0 %vm63_vm1, %v1679_v9  ;;  %3240 = vmatprep.subr.mxu1 %v3354_v3 }
  0xa7   :  { %3238 = vmatmul.mubr.msk.f32.vlgmr.msra.gmra.mrb[0].mxu1 %vm59_vm2, %v3094_v8 }
  0xa8   :  { %v1836_v10 = vpop.permute.xlu1 %1835  ;;  %v1672_v11 = vpop.permute.xlu0 %1671  ;;  %3242 = vmatprep.mubr.msk.f32.mxu1 %vm3355_vm0, %v3354_v3 }
  0xa9   :  { %v1678_v12 = vsel %vm1677_vm7, %v1672_v11, %v1674_v7 }
  0xaa   :  { %3098 = vmatpush1.msk.msra.mxu0 %vm63_vm1, %v1678_v12 }
  0xab   :  { %3099 = vmatmul.mubr.msk.f32.vlgmr.msra.gmra.mrb[0].mxu0 %vm59_vm2, %v3094_v8 }
  0xac   :  { %v1834_v13 = vpop.permute.xlu1 %1833  ;;  %v1838_v14 = vpop.permute.xlu0 %1837  ;;  %1911 = vmatprep.mubr.f32.mxu0 %v3354_v3 }
  0xad   :  { %v1839_v15 = vsel %vm1677_vm7, %v1834_v13, %v1836_v10  ;;  %v1840_v16 = vsel %vm1677_vm7, %v1836_v10, %v1838_v14  ;;  %3241 = vmatpush3.msk.msra.mxu1 %vm63_vm1, %v1838_v14 }
  0xae   :  { %3102 = vmatprep.subr.msk.mxu0 %vm63_vm1, %v1840_v16  ;;  %3245 = vmatprep.subr.mxu1 %v3354_v3 }
  0xaf   :  { %3103 = vmatpush1.msk.msra.mxu0 %vm63_vm1, %v1839_v15  ;;  %3243 = vmatmul.mubr.msk.f32.vlgmr.msra.gmra.mrb[2].mxu1 %vm59_vm2, %v3094_v8 }
  0xb0   :  { %v2008_v17 = vpop.permute.xlu1 %2007  ;;  %v2006_v18 = vpop.permute.xlu0 %2005  ;;  %3104 = vmatmul.mubr.msk.f32.vlgmr.msra.gmra.mrb[2].mxu0 %vm59_vm2, %v3094_v8  ;;  %3247 = vmatprep.mubr.msk.f32.mxu1 %vm3355_vm0, %v3354_v3 }
  0xb1   :  { %v2011_v20 = vsel %vm2009_vm8, %v2006_v18, %v2008_v17  ;;  %3246 = vmatpush3.msk.msra.mxu1 %vm63_vm1, %v2008_v17  ;;  %2085 = vmatprep.mubr.f32.mxu0 %v3354_v3 }
  0xb2   :  { %3110 = vmatprep.subr.msk.mxu0 %vm63_vm1, %v2011_v20  ;;  %3250 = vmatprep.subr.mxu1 %v3354_v3 }
  0xb3   :  { %3248 = vmatmul.mubr.msk.f32.vlgmr.msra.gmra.mrb[0].mxu1 %vm59_vm2, %v3107_v19 }
  0xb4   :  { %v2168_v21 = vpop.permute.xlu1 %2167  ;;  %v2004_v22 = vpop.permute.xlu0 %2003  ;;  %3252 = vmatprep.mubr.msk.f32.mxu1 %vm3355_vm0, %v3354_v3 }
  0xb5   :  { %v2010_v23 = vsel %vm2009_vm8, %v2004_v22, %v2006_v18 }
  0xb6   :  { %3111 = vmatpush1.msk.msra.mxu0 %vm63_vm1, %v2010_v23 }
  0xb7   :  { %3112 = vmatmul.mubr.msk.f32.vlgmr.msra.gmra.mrb[0].mxu0 %vm59_vm2, %v3107_v19 }
  0xb8   :  { %v2166_v24 = vpop.permute.xlu1 %2165  ;;  %v2170_v25 = vpop.permute.xlu0 %2169  ;;  %2243 = vmatprep.mubr.f32.mxu0 %v3354_v3 }
  0xb9   :  { %v2171_v26 = vsel %vm2009_vm8, %v2166_v24, %v2168_v21  ;;  %v2172_v27 = vsel %vm2009_vm8, %v2168_v21, %v2170_v25  ;;  %3251 = vmatpush3.msk.msra.mxu1 %vm63_vm1, %v2170_v25 }
  0xba   :  { %3115 = vmatprep.subr.msk.mxu0 %vm63_vm1, %v2172_v27  ;;  %3255 = vmatprep.subr.mxu1 %v3354_v3 }
  0xbb   :  { %3116 = vmatpush1.msk.msra.mxu0 %vm63_vm1, %v2171_v26  ;;  %3253 = vmatmul.mubr.msk.f32.vlgmr.msra.gmra.mrb[2].mxu1 %vm59_vm2, %v3107_v19 }
  0xbc   :  { %v2340_v28 = vpop.permute.xlu1 %2339  ;;  %v2338_v29 = vpop.permute.xlu0 %2337  ;;  %3257 = vmatprep.mubr.msk.f32.mxu1 %vm3355_vm0, %v3354_v3  ;;  %3117 = vmatmul.mubr.msk.f32.vlgmr.msra.gmra.mrb[2].mxu0 %vm59_vm2, %v3107_v19 }
  0xbd   :  { %v2343_v31 = vsel %vm2341_vm9, %v2338_v29, %v2340_v28  ;;  %3256 = vmatpush3.msk.msra.mxu1 %vm63_vm1, %v2340_v28  ;;  %2417 = vmatprep.mubr.f32.mxu0 %v3354_v3 }
  0xbe   :  { %3123 = vmatprep.subr.msk.mxu0 %vm63_vm1, %v2343_v31  ;;  %3260 = vmatprep.subr.mxu1 %v3354_v3 }
  0xbf   :  { %3258 = vmatmul.mubr.msk.f32.vlgmr.msra.gmra.mrb[0].mxu1 %vm59_vm2, %v3120_v30 }
  0xc0   :  { %v2500_v32 = vpop.permute.xlu1 %2499  ;;  %v2336_v33 = vpop.permute.xlu0 %2335  ;;  %3262 = vmatprep.mubr.msk.f32.mxu1 %vm3355_vm0, %v3354_v3 }
  0xc1   :  { %v2342_v34 = vsel %vm2341_vm9, %v2336_v33, %v2338_v29 }
  0xc2   :  { %3124 = vmatpush1.msk.msra.mxu0 %vm63_vm1, %v2342_v34 }
  0xc3   :  { %3125 = vmatmul.mubr.msk.f32.vlgmr.msra.gmra.mrb[0].mxu0 %vm59_vm2, %v3120_v30 }
  0xc4   :  { %v2498_v35 = vpop.permute.xlu1 %2497  ;;  %v2502_v36 = vpop.permute.xlu0 %2501  ;;  %2575 = vmatprep.mubr.f32.mxu0 %v3354_v3 }
  0xc5   :  { %v2503_v37 = vsel %vm2341_vm9, %v2498_v35, %v2500_v32  ;;  %v2504_v38 = vsel %vm2341_vm9, %v2500_v32, %v2502_v36  ;;  %3261 = vmatpush3.msk.msra.mxu1 %vm63_vm1, %v2502_v36 }
  0xc6   :  { %3128 = vmatprep.subr.msk.mxu0 %vm63_vm1, %v2504_v38  ;;  %3263 = vmatmul.mubr.msk.f32.vlgmr.msra.gmra.mrb[2].mxu1 %vm59_vm2, %v3120_v30 }
  0xc7   :  { %3129 = vmatpush1.msk.msra.mxu0 %vm63_vm1, %v2503_v37  ;;  %3265 = vmatprep.subr.mxu1 %v3354_v3 }
  0xc8   :  { %v2672_v40 = vpop.permute.xlu1 %2671  ;;  %v2670_v41 = vpop.permute.xlu0 %2669  ;;  %3267 = vmatprep.mubr.msk.f32.mxu1 %vm3355_vm0, %v3354_v3  ;;  %3130 = vmatmul.mubr.msk.f32.vlgmr.msra.gmra.mrb[2].mxu0 %vm59_vm2, %v3120_v30 }
  0xc9   :  { %v2675_v42 = vsel %vm2673_vm10, %v2670_v41, %v2672_v40  ;;  %3266 = vmatpush3.msk.msra.mxu1 %vm63_vm1, %v2672_v40  ;;  %2749 = vmatprep.mubr.f32.mxu0 %v3354_v3 }
  0xca   :  { %3136 = vmatprep.subr.msk.mxu0 %vm63_vm1, %v2675_v42  ;;  %3268 = vmatmul.mubr.msk.f32.vlgmr.msra.gmra.mrb[0].mxu1 %vm59_vm2, %v3133_v39 }
  0xcb   :  { %3270 = vmatprep.subr.mxu1 %v3354_v3  ;;  %3272 = vmatprep.mubr.msk.f32.mxu1 %vm3355_vm0, %v3354_v3 }
  0xcc   :  { %v2832_v43 = vpop.permute.xlu1 %2831  ;;  %v2668_v44 = vpop.permute.xlu0 %2667 }
  0xcd   :  { %v2674_v45 = vsel %vm2673_vm10, %v2668_v44, %v2670_v41 }
  0xce   :  { %3137 = vmatpush1.msk.msra.mxu0 %vm63_vm1, %v2674_v45 }
  0xcf   :  { %3138 = vmatmul.mubr.msk.f32.vlgmr.msra.gmra.mrb[0].mxu0 %vm59_vm2, %v3133_v39 }
  0xd0   :  { %v2830_v46 = vpop.permute.xlu1 %2829  ;;  %v2834_v47 = vpop.permute.xlu0 %2833  ;;  %2907 = vmatprep.mubr.f32.mxu0 %v3354_v3 }
  0xd1   :  { %v2835_v48 = vsel %vm2673_vm10, %v2830_v46, %v2832_v43  ;;  %v2836_v49 = vsel %vm2673_vm10, %v2832_v43, %v2834_v47  ;;  %3271 = vmatpush3.msk.msra.mxu1 %vm63_vm1, %v2834_v47 }
  0xd2   :  { %3141 = vmatprep.subr.msk.mxu0 %vm63_vm1, %v2836_v49  ;;  %3273 = vmatmul.mubr.msk.f32.vlgmr.msra.gmra.mrb[2].mxu1 %vm59_vm2, %v3133_v39 }
  0xd3   :  { %3142 = vmatpush1.msk.msra.mxu0 %vm63_vm1, %v2835_v48 }
  0xd4   :  { %3143 = vmatmul.mubr.msk.f32.vlgmr.msra.gmra.mrb[2].mxu0 %vm59_vm2, %v3133_v39 }
  0xe1   :  { %v2995_v54 = vpop.permute.xlu0 %2994  ;;  %v3006_v55 = vpop.permute.xlu1 %3005 }
 0x19d   :  { %v2822_v50 = vpop.f32.mrb[0].mxu1 }
 0x19e   :  { %v3269_v51 = vpop.f32.mrb[1].mxu1 }
 0x1a2   :  { %v2751_v52 = vpop.f32.mrb[0].mxu0 }
 0x1a3   :  { %v2753_v53 = vpop.f32.mrb[1].mxu0 }
 0x1a5   :  { %v2980_v3 = vpop.f32.mrb[2].mxu1 }
 0x1a6   :  { %v3002_v56 = vsub.f32 %v2822_v50, %v2980_v3  ;;  %v2999_v57 = vadd.f32 %v2995_v54, %v2980_v3  ;;  %v3274_v58 = vpop.f32.mrb[3].mxu1 }
 0x1a7   :  { %v2909_v59 = vpop.f32.mrb[2].mxu0 }
 0x1a8   :  { %3148 = vst.msk [vmem:[%s3753_s5 + $0x28] sm:$0xff] %vm3016_vm11, %v2999_v57  ;;  %v3010_v60 = vmul.f32 %v3006_v55, %v3002_v56  ;;  %v2997_v61 = vadd.f32 %v2995_v54, %v2909_v59  ;;  %v3000_v62 = vsub.f32 %v2751_v52, %v2909_v59  ;;  %v2911_v63 = vpop.f32.mrb[3].mxu0 }
 0x1a9   :  { %v2998_v0 = vadd.f32 %v2995_v54, %v2911_v63  ;;  %v3001_v1 = vsub.f32 %v2753_v53, %v2911_v63 }
 0x1aa   :  { %v3013_v2 = vadd.f32 %v3010_v60, %v2999_v57  ;;  %v3008_v4 = vmul.f32 %v3006_v55, %v3000_v62  ;;  %3146 = vst [vmem:[%s3753_s5 + $0x18] sm:$0xff] %v2997_v61 }
 0x1ab   :  { %v3009_v5 = vmul.f32 %v3006_v55, %v3001_v1  ;;  %3147 = vst [vmem:[%s3753_s5 + $0x20] sm:$0xff] %v2998_v0 }
 0x1ac   :  { %3017 = vst.msk [vmem:[%s3753_s5 + $0x10] sm:$0xff] %vm3016_vm11, %v3013_v2  ;;  %v3011_v6 = vadd.f32 %v3008_v4, %v2997_v61 }
 0x1ad   :  { %v3012_v7 = vadd.f32 %v3009_v5, %v2998_v0 }
 0x1ae   :  { %3014 = vst [vmem:[%s3753_s5] sm:$0xff] %v3011_v6 }
 0x1af   :  { %3015 = vst [vmem:[%s3753_s5 + $0x8] sm:$0xff] %v3012_v7 }

</bundles_post_ra>
